<compile_context>
chip_gen: v6e
topology: v6e:2x2x1
jax: 0.10.0
libtpu: 0.0.40
codegen_flags: <defaults>
</compile_context>

<pallas_src>
import functools

import jax
import jax.numpy as jnp
from jax.experimental import pallas as pl
from jax.experimental.pallas import tpu as pltpu


# ----------------------------- Pallas kernel --------------------------------


def _double_deep_sets_kernel(
    ids_ref,      # [R, 1]    i32  stacked node ids (receivers pre-offset by +V)
    seg_ref,      # [1, R]    i32  block-global segment (graph) ids
    slab_ref,     # [Rows,2H] f32  packed parameters (see pack_params)
    out_ref,      # [B, C]    f32  per-graph logits
    *,
    table_rows,   # static: 2V rows of the fused embedding+phi table
    offs,         # static: row offsets of each chunk inside the slab
):
    n_rows = ids_ref.shape[0]
    n_segments, n_out = out_ref.shape
    two_h = slab_ref.shape[1]

    # ---- fused embedding-gather + phi + sender/receiver routing (one matmul)
    ids = ids_ref[...]                                                # [R, 1]
    tab_iota = jax.lax.broadcasted_iota(jnp.int32, (n_rows, table_rows), 1)
    oh_node = (tab_iota == ids).astype(jnp.float32)                   # [R, 2V]
    p_tab = slab_ref[offs["P"]:offs["P"] + table_rows, :]             # [2V, 2H]
    x = jnp.dot(oh_node, p_tab, preferred_element_type=jnp.float32)   # [R, 2H]

    # ---- segment-sum pooling for both sides in one matmul -> [B, 2H] = concat
    segs = seg_ref[...]                                               # [1, R]
    seg_iota = jax.lax.broadcasted_iota(jnp.int32, (n_segments, n_rows), 0)
    oh_seg = (seg_iota == segs).astype(jnp.float32)                   # [B, R]
    pooled = jnp.dot(oh_seg, x, preferred_element_type=jnp.float32)   # [B, 2H]

    # ---- rho for both sides as one block-diagonal matmul (no concat needed)
    w_rho = slab_ref[offs["w_rho"]:offs["w_rho"] + two_h, :]          # [2H, 2H]
    b_rho = slab_ref[offs["b_rho"]:offs["b_rho"] + 1, :]              # [1, 2H]
    g = jnp.maximum(
        jnp.dot(pooled, w_rho, preferred_element_type=jnp.float32) + b_rho, 0.0)

    # ---- pred_mlp: Dropout is identity at inference time.
    w1 = slab_ref[offs["w1"]:offs["w1"] + two_h, :]                   # [2H, 2H] (cols [0,H) valid)
    b1 = slab_ref[offs["b1"]:offs["b1"] + 1, :]
    hid = jnp.maximum(
        jnp.dot(g, w1, preferred_element_type=jnp.float32) + b1, 0.0)

    w2 = slab_ref[offs["w2"]:offs["w2"] + two_h, :]                   # [2H, 2H] (block [0,H)x[0,C) valid)
    b2 = slab_ref[offs["b2"]:offs["b2"] + 1, :]
    logits = jnp.dot(hid, w2, preferred_element_type=jnp.float32) + b2
    out_ref[...] = logits[:, :n_out].astype(out_ref.dtype)


# --------------------------- parameter packing -------------------------------


def pack_params(p):
    """Fold embedding+phi(+sender/receiver routing) into one [2V, 2H] table and
    pack everything into one lane-dense, 8-row-aligned f32 slab.  Done once per
    parameter set (outside the hot path)."""
    hidden = p["w_rho_s"].shape[0]
    two_h = 2 * hidden
    vocab = p["embedding"].shape[0]
    c_out = p["w2"].shape[1]

    # sender rows route to lanes [0,H); receiver rows route to lanes [H,2H)
    p_s = jnp.maximum(p["embedding"] @ p["w_phi_s"] + p["b_phi_s"], 0.0)   # [V, H]
    p_r = jnp.maximum(p["embedding"] @ p["w_phi_r"] + p["b_phi_r"], 0.0)   # [V, H]
    zeros_vh = jnp.zeros((vocab, hidden), jnp.float32)
    p_tab = jnp.concatenate(
        [jnp.concatenate([p_s, zeros_vh], axis=1),
         jnp.concatenate([zeros_vh, p_r], axis=1)], axis=0)                # [2V, 2H]

    # block-diagonal rho so the pooled [B, 2H] maps straight to [g_s | g_r]
    w_rho_bd = (jnp.zeros((two_h, two_h), jnp.float32)
                .at[:hidden, :hidden].set(p["w_rho_s"])
                .at[hidden:, hidden:].set(p["w_rho_r"]))
    b_rho = jnp.concatenate([p["b_rho_s"], p["b_rho_r"]], axis=1)

    # pred MLP, zero-padded to the 2H lane width
    w1p = jnp.zeros((two_h, two_h), jnp.float32).at[:, :hidden].set(p["w1"])
    b1p = jnp.zeros((1, two_h), jnp.float32).at[:, :hidden].set(p["b1"])
    w2p = jnp.zeros((two_h, two_h), jnp.float32).at[:hidden, :c_out].set(p["w2"])
    b2p = jnp.zeros((1, two_h), jnp.float32).at[:, :c_out].set(p["b2"])

    def pad8(a):  # keep every chunk start sublane(8)-aligned
        r = (-a.shape[0]) % 8
        if r == 0:
            return a
        return jnp.concatenate([a, jnp.zeros((r, a.shape[1]), a.dtype)], axis=0)

    chunks = [("P", p_tab), ("w_rho", w_rho_bd), ("b_rho", b_rho),
              ("w1", w1p), ("b1", b1p), ("w2", w2p), ("b2", b2p)]
    offs, rows, off = {}, [], 0
    for name, arr in chunks:
        arr = pad8(arr)
        offs[name] = off
        off += arr.shape[0]
        rows.append(arr)
    slab = jnp.concatenate(rows, axis=0)          # [Rows, 2H], 2H = 128 lanes
    return slab, offs, c_out, hidden, vocab


# ------------------------------ forward wrapper -------------------------------


def double_deep_sets_forward(node_ids, seg_ids, slab, *, segments_per_block,
                             table_rows, num_out, offs):
    """node_ids: [NB, R, 1] i32 (receiver ids pre-offset by +V),
    seg_ids: [NB, 1, R] i32 block-global graph ids, slab: [Rows, 2H] f32.
    Returns [NB, segments_per_block, num_out] f32 logits."""
    nb, r, _ = node_ids.shape
    rows, lanes = slab.shape
    kernel = functools.partial(_double_deep_sets_kernel,
                               table_rows=table_rows, offs=offs)
    return pl.pallas_call(
        kernel,
        out_shape=jax.ShapeDtypeStruct((nb, segments_per_block, num_out),
                                       jnp.float32),
        grid_spec=pltpu.PrefetchScalarGridSpec(
            num_scalar_prefetch=0,
            grid=(nb,),
            in_specs=[
                pl.BlockSpec((None, r, 1), lambda b: (b, 0, 0)),
                pl.BlockSpec((None, 1, r), lambda b: (b, 0, 0)),
                pl.BlockSpec((rows, lanes), lambda b: (0, 0)),   # resident params
            ],
            out_specs=pl.BlockSpec((None, segments_per_block, num_out),
                                   lambda b: (b, 0, 0)),
        ),
        compiler_params=pltpu.CompilerParams(
            dimension_semantics=("parallel",)),
    )(node_ids, seg_ids, slab)


# --------------------------- deterministic params ----------------------------


def make_params(key, *, vocab, emb_dim, hidden_dim, num_classes):
    c_out = num_classes if num_classes > 2 else 1
    ks = jax.random.split(key, 13)
    n = lambda k, shape, scale=0.1: (scale * jax.random.normal(k, shape)).astype(
        jnp.float32)
    return {
        "embedding": n(ks[0], (vocab, emb_dim)),
        # sender DeepSets
        "w_phi_s": n(ks[1], (emb_dim, hidden_dim)),
        "b_phi_s": n(ks[2], (1, hidden_dim)),
        "w_rho_s": n(ks[3], (hidden_dim, hidden_dim)),
        "b_rho_s": n(ks[4], (1, hidden_dim)),
        # receiver DeepSets
        "w_phi_r": n(ks[5], (emb_dim, hidden_dim)),
        "b_phi_r": n(ks[6], (1, hidden_dim)),
        "w_rho_r": n(ks[7], (hidden_dim, hidden_dim)),
        "b_rho_r": n(ks[8], (1, hidden_dim)),
        # pred MLP
        "w1": n(ks[9], (2 * hidden_dim, hidden_dim)),
        "b1": n(ks[10], (1, hidden_dim)),
        "w2": n(ks[11], (hidden_dim, c_out)),
        "b2": n(ks[12], (1, c_out)),
    }


def reference_forward(senders, receivers, s_batch, r_batch, p, *, num_graphs):
    """Pure-JAX reference of the same forward pass (for correctness check)."""
    def deep_sets(ids, bid, wp, bp, wr, br):
        h = jnp.maximum(p["embedding"][ids] @ wp + bp, 0.0)
        pooled = jax.ops.segment_sum(h, bid, num_segments=num_graphs)
        return jnp.maximum(pooled @ wr + br, 0.0)

    gs = deep_sets(senders, s_batch, p["w_phi_s"], p["b_phi_s"],
                   p["w_rho_s"], p["b_rho_s"])
    gr = deep_sets(receivers, r_batch, p["w_phi_r"], p["b_phi_r"],
                   p["w_rho_r"], p["b_rho_r"])
    cat = jnp.concatenate([gs, gr], axis=-1)
    return jnp.maximum(cat @ p["w1"] + p["b1"], 0.0) @ p["w2"] + p["b2"]


# ----------------------------------- main ------------------------------------


if __name__ == "__main__":
    VOCAB = 64            # node-id vocabulary of the synthetic NodeIdFeatureEncoder
    EMB_DIM = 16          # embedding feature dim
    HIDDEN = 64           # cfg.hidden_dim  (2H = 128 -> lane-dense slabs)
    NUM_CLASSES = 2       # -> single-logit output
    NUM_GRAPHS = 4        # subgraphs per graph-batch
    N_SEND = 16           # sender nodes per graph-batch
    N_RECV = 16           # receiver nodes per graph-batch
    NUM_BATCHES = 8       # independent graph-batches
    GROUPS_PER_BLOCK = 4  # graph-batches packed into one grid step

    key = jax.random.PRNGKey(0)
    k_par, k_s, k_r = jax.random.split(key, 3)

    params = make_params(k_par, vocab=VOCAB, emb_dim=EMB_DIM,
                         hidden_dim=HIDDEN, num_classes=NUM_CLASSES)
    # One-time parameter preprocessing (embedding+phi folding, slab packing).
    slab, offs, C_OUT, _, _ = pack_params(params)
    slab = jax.block_until_ready(slab)

    senders = jax.random.randint(k_s, (NUM_BATCHES, N_SEND), 0, VOCAB,
                                 dtype=jnp.int32)
    receivers = jax.random.randint(k_r, (NUM_BATCHES, N_RECV), 0, VOCAB,
                                   dtype=jnp.int32)
    # sorted segment ids assigning nodes to graphs 0..NUM_GRAPHS-1 (same layout
    # for every graph-batch in this synthetic example)
    senders_batch = jnp.repeat(jnp.arange(NUM_GRAPHS, dtype=jnp.int32),
                               N_SEND // NUM_GRAPHS)
    receivers_batch = jnp.repeat(jnp.arange(NUM_GRAPHS, dtype=jnp.int32),
                                 N_RECV // NUM_GRAPHS)

    # Kernel-side packed inputs: stacked [sender | receiver] rows with receiver
    # node ids offset by +V (routes them to the receiver half of the table),
    # segment ids made block-global so GROUPS_PER_BLOCK batches share one step.
    n_tot = N_SEND + N_RECV
    node_ids = jnp.concatenate([senders, receivers + VOCAB], axis=1)   # [G, n_tot]
    graph_ids = jnp.tile(
        jnp.concatenate([senders_batch, receivers_batch])[None, :],
        (NUM_BATCHES, 1)).astype(jnp.int32)                            # [G, n_tot]

    nb = NUM_BATCHES // GROUPS_PER_BLOCK
    rows_per_block = GROUPS_PER_BLOCK * n_tot
    segs_per_block = GROUPS_PER_BLOCK * NUM_GRAPHS

    ids_in = node_ids.reshape(nb, rows_per_block, 1).astype(jnp.int32)          # [NB, R, 1]
    seg_in = (graph_ids.reshape(nb, GROUPS_PER_BLOCK, n_tot)
              + (jnp.arange(GROUPS_PER_BLOCK, dtype=jnp.int32)
                 * NUM_GRAPHS)[None, :, None]
              ).reshape(nb, 1, rows_per_block).astype(jnp.int32)                # [NB, 1, R]

    fwd = jax.jit(functools.partial(
        double_deep_sets_forward, segments_per_block=segs_per_block,
        table_rows=2 * VOCAB, num_out=C_OUT, offs=offs))
    out = fwd(ids_in, seg_in, slab)
    out = jax.block_until_ready(out)
    out = out.reshape(NUM_BATCHES, NUM_GRAPHS, C_OUT)

    ref = jax.vmap(
        lambda s, r: reference_forward(s, r, senders_batch, receivers_batch,
                                       params, num_graphs=NUM_GRAPHS)
    )(senders, receivers)

    assert out.shape == (NUM_BATCHES, NUM_GRAPHS, C_OUT)
    assert jnp.allclose(out, ref, atol=1e-4, rtol=1e-4)
    print("KERNEL_OK")
</pallas_src>

<mosaic_0001>
module attributes {stable_mosaic.version = 11 : i64} {
  func.func @_double_deep_sets_kernel(%arg0: i32, %arg1: memref<1x128x1xi32, #tpu.memory_space<vmem>>, %arg2: memref<1x1x128xi32, #tpu.memory_space<vmem>>, %arg3: memref<536x128xf32, #tpu.memory_space<vmem>>, %arg4: memref<1x16x1xf32, #tpu.memory_space<vmem>>) attributes {dimension_semantics = [#tpu.dimension_semantics<parallel>], iteration_bounds = array<i64: 2>, scalar_prefetch = 0 : i64, scratch_operands = 0 : i64, tpu.core_type = #tpu.core_type<tc>, window_params = [{transform_indices = @transform_0, window_bounds = array<i64: 1, 128, 1>}, {transform_indices = @transform_1, window_bounds = array<i64: 1, 1, 128>}, {pipeline_mode = #tpu.pipeline_mode<synchronous>, transform_indices = @transform_2, window_bounds = array<i64: 536, 128>}, {transform_indices = @transform_3, window_bounds = array<i64: 1, 16, 1>}]} {
    %c0 = arith.constant 0 : index
    %c0_0 = arith.constant 0 : index
    %c0_1 = arith.constant 0 : index
    %0 = vector.load %arg1[%c0, %c0_0, %c0_1] : memref<1x128x1xi32, #tpu.memory_space<vmem>>, vector<1x128x1xi32>
    %1 = vector.shape_cast %0 : vector<1x128x1xi32> to vector<128x1xi32>
    %2 = tpu.iota {dimensions = array<i32: 1>} : vector<128x128xi32>
    %3 = vector.broadcast %1 : vector<128x1xi32> to vector<128x128xi32>
    %4 = arith.cmpi eq, %2, %3 : vector<128x128xi32>
    %5 = arith.extui %4 : vector<128x128xi1> to vector<128x128xi32>
    %6 = arith.sitofp %5 : vector<128x128xi32> to vector<128x128xf32>
    %c0_2 = arith.constant 0 : index
    %c0_3 = arith.constant 0 : index
    %7 = vector.load %arg3[%c0_2, %c0_3] : memref<536x128xf32, #tpu.memory_space<vmem>>, vector<128x128xf32>
    %cst = arith.constant dense<0.000000e+00> : vector<128x128xf32>
    %8 = tpu.matmul %6, %7, %cst {dimension_numbers = #tpu.dot_dimension_numbers<[1], [0], [0], [1], [0, 0, 1, 1], [], []>} : vector<128x128xf32>, vector<128x128xf32>, vector<128x128xf32> -> vector<128x128xf32>
    %c0_4 = arith.constant 0 : index
    %c0_5 = arith.constant 0 : index
    %c0_6 = arith.constant 0 : index
    %9 = vector.load %arg2[%c0_4, %c0_5, %c0_6] : memref<1x1x128xi32, #tpu.memory_space<vmem>>, vector<1x1x128xi32>
    %10 = vector.shape_cast %9 : vector<1x1x128xi32> to vector<1x128xi32>
    %11 = tpu.iota {dimensions = array<i32: 0>} : vector<16x128xi32>
    %12 = vector.broadcast %10 : vector<1x128xi32> to vector<16x128xi32>
    %13 = arith.cmpi eq, %11, %12 : vector<16x128xi32>
    %14 = arith.extui %13 : vector<16x128xi1> to vector<16x128xi32>
    %15 = arith.sitofp %14 : vector<16x128xi32> to vector<16x128xf32>
    %cst_7 = arith.constant dense<0.000000e+00> : vector<16x128xf32>
    %16 = tpu.matmul %15, %8, %cst_7 {dimension_numbers = #tpu.dot_dimension_numbers<[1], [0], [0], [1], [0, 0, 1, 1], [], []>} : vector<16x128xf32>, vector<128x128xf32>, vector<16x128xf32> -> vector<16x128xf32>
    %c128 = arith.constant 128 : index
    %c0_8 = arith.constant 0 : index
    %17 = vector.load %arg3[%c128, %c0_8] : memref<536x128xf32, #tpu.memory_space<vmem>>, vector<128x128xf32>
    %c256 = arith.constant 256 : index
    %c0_9 = arith.constant 0 : index
    %18 = vector.load %arg3[%c256, %c0_9] : memref<536x128xf32, #tpu.memory_space<vmem>>, vector<1x128xf32>
    %cst_10 = arith.constant dense<0.000000e+00> : vector<16x128xf32>
    %19 = tpu.matmul %16, %17, %cst_10 {dimension_numbers = #tpu.dot_dimension_numbers<[1], [0], [0], [1], [0, 0, 1, 1], [], []>} : vector<16x128xf32>, vector<128x128xf32>, vector<16x128xf32> -> vector<16x128xf32>
    %20 = vector.broadcast %18 : vector<1x128xf32> to vector<16x128xf32>
    %21 = arith.addf %19, %20 : vector<16x128xf32>
    %cst_11 = arith.constant 0.000000e+00 : f32
    %22 = vector.broadcast %cst_11 : f32 to vector<16x128xf32>
    %23 = arith.maximumf %21, %22 : vector<16x128xf32>
    %c264 = arith.constant 264 : index
    %c0_12 = arith.constant 0 : index
    %24 = vector.load %arg3[%c264, %c0_12] : memref<536x128xf32, #tpu.memory_space<vmem>>, vector<128x128xf32>
    %c392 = arith.constant 392 : index
    %c0_13 = arith.constant 0 : index
    %25 = vector.load %arg3[%c392, %c0_13] : memref<536x128xf32, #tpu.memory_space<vmem>>, vector<1x128xf32>
    %cst_14 = arith.constant dense<0.000000e+00> : vector<16x128xf32>
    %26 = tpu.matmul %23, %24, %cst_14 {dimension_numbers = #tpu.dot_dimension_numbers<[1], [0], [0], [1], [0, 0, 1, 1], [], []>} : vector<16x128xf32>, vector<128x128xf32>, vector<16x128xf32> -> vector<16x128xf32>
    %27 = vector.broadcast %25 : vector<1x128xf32> to vector<16x128xf32>
    %28 = arith.addf %26, %27 : vector<16x128xf32>
    %cst_15 = arith.constant 0.000000e+00 : f32
    %29 = vector.broadcast %cst_15 : f32 to vector<16x128xf32>
    %30 = arith.maximumf %28, %29 : vector<16x128xf32>
    %c400 = arith.constant 400 : index
    %c0_16 = arith.constant 0 : index
    %31 = vector.load %arg3[%c400, %c0_16] : memref<536x128xf32, #tpu.memory_space<vmem>>, vector<128x128xf32>
    %c528 = arith.constant 528 : index
    %c0_17 = arith.constant 0 : index
    %32 = vector.load %arg3[%c528, %c0_17] : memref<536x128xf32, #tpu.memory_space<vmem>>, vector<1x128xf32>
    %cst_18 = arith.constant dense<0.000000e+00> : vector<16x128xf32>
    %33 = tpu.matmul %30, %31, %cst_18 {dimension_numbers = #tpu.dot_dimension_numbers<[1], [0], [0], [1], [0, 0, 1, 1], [], []>} : vector<16x128xf32>, vector<128x128xf32>, vector<16x128xf32> -> vector<16x128xf32>
    %34 = vector.broadcast %32 : vector<1x128xf32> to vector<16x128xf32>
    %35 = arith.addf %33, %34 : vector<16x128xf32>
    %36 = vector.extract_strided_slice %35 {offsets = [0, 0], sizes = [16, 1], strides = [1, 1]} : vector<16x128xf32> to vector<16x1xf32>
    %c0_19 = arith.constant 0 : index
    %c0_20 = arith.constant 0 : index
    %c0_21 = arith.constant 0 : index
    %37 = vector.load %arg4[%c0_19, %c0_20, %c0_21] : memref<1x16x1xf32, #tpu.memory_space<vmem>>, vector<1x16x1xf32>
    %38 = vector.shape_cast %37 : vector<1x16x1xf32> to vector<16x1xf32>
    %39 = vector.shape_cast %36 : vector<16x1xf32> to vector<1x16x1xf32>
    tpu.vector_store %arg4[%c0_19, %c0_20, %c0_21], %39 {strides = array<i32>} : memref<1x16x1xf32, #tpu.memory_space<vmem>>, vector<1x16x1xf32>,
    return
  }
  func.func @transform_0(%arg0: i32) -> (i32, i32, i32) {
    %c0_i32 = arith.constant 0 : i32
    %c0_i32_0 = arith.constant 0 : i32
    %c0_i32_1 = arith.constant 0 : i32
    return %arg0, %c0_i32, %c0_i32_0 : i32, i32, i32
  }
  func.func @transform_1(%arg0: i32) -> (i32, i32, i32) {
    %c0_i32 = arith.constant 0 : i32
    %c0_i32_0 = arith.constant 0 : i32
    %c0_i32_1 = arith.constant 0 : i32
    return %arg0, %c0_i32, %c0_i32_0 : i32, i32, i32
  }
  func.func @transform_2(%arg0: i32) -> (i32, i32) {
    %c0_i32 = arith.constant 0 : i32
    %c0_i32_0 = arith.constant 0 : i32
    %c0_i32_1 = arith.constant 0 : i32
    return %c0_i32, %c0_i32_0 : i32, i32
  }
  func.func @transform_3(%arg0: i32) -> (i32, i32, i32) {
    %c0_i32 = arith.constant 0 : i32
    %c0_i32_0 = arith.constant 0 : i32
    %c0_i32_1 = arith.constant 0 : i32
    return %arg0, %c0_i32, %c0_i32_0 : i32, i32, i32
  }
}

</mosaic_0001>

<bundles_post_ra>
// kernel: double_deep_sets_forward.1
= control target key start
LH: loop header
LB: loop body
LE: loop exit
PB: predicated region body
PF: predicated region fallthrough
CT: control target
= control target key end

     0   :  { %8 = vsyncpa [#allocation3], 0  ;;  %s1378_s12 = smov 0   ;;  %s1471_s0 = inlined_call_operand.vmem [shape: s32[2,128,1], index: 0, kind: input, shape index: {}]   ;;  %s1472_s1 = inlined_call_operand.vmem [shape: s32[2,1,128], index: 1, kind: input, shape index: {}]   ;;  %s1473_s2 = inlined_call_operand.hbm [shape: f32[536,128], index: 2, kind: input, shape index: {}]   ;;  %s1474_s3 = inlined_call_operand.vmem [shape: f32[2,16,1], index: 3, kind: output, shape index: {}]  }
   0x1 LB: > { %s1384_s13 = sadd.s32 4294967295, %s1351_s12   ;;  %p937_p0 = scmp.ge.s32.totalorder %s1351_s12, 1  ;;  %s1351_s12 = sphi %s1378_s12, %s14_s12  }
   0x2   : > { %p118_p1 = scmp.lt.s32.totalorder %s1351_s12, 3  ;;  %s1353_s14 = smov [#allocation2]  }
   0x3   : > { %s130_s15 = sshll.u32 %s1353_s14, 4  ;;  %p1298_p3 = scmp.eq.s32.totalorder %s1384_s13, 0  ;;  %s131_s15 = int_to_ptr.vmem [resolvable:$true] %s130_s15 }
   0x4   : > { %p1388_p2 = pnand %p937_p0, %p118_p1  ;;  %s1326_s17 = scalar_lea.vmem %s131_s15, 8576 }
   0x5   : > { %p1327_p7 = scmp.ne.s32.totalorder %s131_s15, %s1326_s17  ;;  %p1334_p10 = scmp.lt.s32.totalorder %s131_s15, %s131_s15 }
   0x6   : > { %p1294_p4 = pneg %p1388_p2  ;;  %p1335_p11 = scmp.lt.s32.totalorder %s1326_s17, %s1326_s17 }
   0x8   : > { %p1295_p5 = pnand %p1298_p3, %p1294_p4  ;;  %p1336_p12 = por %p1335_p11, %p1334_p10 }
   0xa   : > { %p1317_p6 = pneg %p1295_p5 }
   0xc   : > { %p1329_p8 = pnand %p1327_p7, %p1317_p6 }
   0xe   : > { %p1330_p9 = pneg %p1329_p8 }
  0x10   : > { %p1337_p13 = pnand %p1336_p12, %p1330_p9 }
  0x12   : > { %1340 = shalt.err (!%p1337_p13)
}
  0x13   : > { %s1354_s18 = smov 128   ;;  %s1355_s19 = smov 8  }
  0x14   : > { %1297 = dma.hbm_to_vmem [thread:$0]  (!%p1295_p5), %s1473_s2, 8576, %s131_s15, [#allocation3], %s1354_s18, %s1354_s18, %s1355_s19  }
  0x15   : > { %160 = sbr.rel (%p1388_p2) target bundleno = 1209 (0x4b9), region = 32 }
  0x1a   : > { %1346 = dma.done.wait (%p1298_p3), [#allocation3], 8576  }
  0x1b   : > { %1348 = vsyncadd (%p1298_p3), [#allocation3], 4294958720  ;;  %p187_p0 = scmp.lt.s32.totalorder %s1384_s13, 1  ;;  %v1356_v0 = vmov 0   ;;  %v329_v5 = vld [vmem:[#allocation2 + $0x78] sm:$0xff]  ;;  %v328_v6 = vld [vmem:[#allocation2 + $0x70] sm:$0xff]  ;;  %v216_v33 = vlaneseq }
  0x1c   : > { %1314 = vset.pattern.permute.xlu1 %v1356_v0  ;;  %1313 = vset.pattern.permute.xlu0 %v1356_v0  ;;  %v327_v9 = vld [vmem:[#allocation2 + $0x68] sm:$0xff]  ;;  %v326_v12 = vld [vmem:[#allocation2 + $0x60] sm:$0xff]  ;;  %v325_v13 = vld [vmem:[#allocation2 + $0x58] sm:$0xff]  ;;  %v1357_v37 = vmov 1.0  }
  0x1d   : > { %s1477_s13 = smov (!%p187_p0, %s1384_s13), 1  ;;  %1094 = vmatprep.subr.mxu0 %v329_v5  ;;  %v324_v16 = vld [vmem:[#allocation2 + $0x50] sm:$0xff]  ;;  %v323_v19 = vld [vmem:[#allocation2 + $0x48] sm:$0xff]  ;;  %v322_v20 = vld [vmem:[#allocation2 + $0x40] sm:$0xff]  ;;  %v217_v34 = vand.u32 127, %v216_v33  ;;  %v477_v52 = vshrl.u32 %v216_v33, 7 }
  0x1e   : > { %s988_s22 = sshll.u32 %s1477_s13, 7  ;;  %1095 = vmatpush3.msra.mxu0 %v329_v5  ;;  %v321_v23 = vld [vmem:[#allocation2 + $0x38] sm:$0xff]  ;;  %v320_v26 = vld [vmem:[#allocation2 + $0x30] sm:$0xff]  ;;  %v319_v27 = vld [vmem:[#allocation2 + $0x28] sm:$0xff]  ;;  %s194_s28 = scalar_lea.vmem %s1472_s1, %s1477_s13 }
  0x1f   : > { %s1414_s25 = scalar_lea.vmem %s1471_s0, %s988_s22  ;;  %1096 = vmatprep.subr.mxu0 %v328_v6  ;;  %v318_v28 = vld [vmem:[#allocation2 + $0x20] sm:$0xff]  ;;  %v317_v29 = vld [vmem:[#allocation2 + $0x18] sm:$0xff]  ;;  %v316_v30 = vld [vmem:[#allocation2 + $0x10] sm:$0xff]  ;;  %v1454_v54 = vadd.s32 8, %v477_v52  ;;  %s989_s29 = sshll.u32 %s1477_s13, 4 }
  0x20   : > { %v202_v1 = vld [vmem:[%s1414_s25 + $0x10] sm:$0xff]  ;;  %v200_v2 = vld [vmem:[%s1414_s25] sm:$0xff]  ;;  %v203_v3 = vld [vmem:[%s1414_s25 + $0x18] sm:$0xff]  ;;  %1097 = vmatpush3.msra.mxu0 %v328_v6  ;;  %s199_s5 = scalar_lea.vmem %s1474_s3, %s989_s29 }
  0x21   : > { %225 = vperm.xlu1 %1314, %v202_v1   ;;  %219 = vperm.xlu0 %1313, %v200_v2   ;;  %v201_v4 = vld [vmem:[%s1414_s25 + $0x8] sm:$0xff]  ;;  %v204_v8 = vld [vmem:[%s1414_s25 + $0x20] sm:$0xff]  ;;  %v207_v10 = vld [vmem:[%s1414_s25 + $0x38] sm:$0xff] }
  0x22   : > { %v205_v7 = vld [vmem:[%s1414_s25 + $0x28] sm:$0xff]  ;;  %v206_v11 = vld [vmem:[%s1414_s25 + $0x30] sm:$0xff]  ;;  %1098 = vmatprep.subr.mxu0 %v327_v9  ;;  %v208_v15 = vld [vmem:[%s1414_s25 + $0x40] sm:$0xff] }
  0x23   : > { %1099 = vmatpush3.msra.mxu0 %v327_v9  ;;  %v209_v14 = vld [vmem:[%s1414_s25 + $0x48] sm:$0xff]  ;;  %v211_v17 = vld [vmem:[%s1414_s25 + $0x58] sm:$0xff]  ;;  %v210_v18 = vld [vmem:[%s1414_s25 + $0x50] sm:$0xff] }
  0x24   : > { %1100 = vmatprep.subr.mxu0 %v326_v12  ;;  %v213_v21 = vld [vmem:[%s1414_s25 + $0x68] sm:$0xff]  ;;  %v212_v22 = vld [vmem:[%s1414_s25 + $0x60] sm:$0xff]  ;;  %v215_v24 = vld [vmem:[%s1414_s25 + $0x78] sm:$0xff] }
  0x25   : > { %228 = vperm.xlu1 %1314, %v203_v3   ;;  %222 = vperm.xlu0 %1313, %v201_v4   ;;  %v214_v25 = vld [vmem:[%s1414_s25 + $0x70] sm:$0xff]  ;;  %v315_v31 = vld [vmem:[#allocation2 + $0x8] sm:$0xff]  ;;  %v314_v32 = vld [vmem:[#allocation2] sm:$0xff] }
  0x26   : > { %1101 = vmatpush3.msra.mxu0 %v326_v12  ;;  %v1452_v53 = vld [vmem:[%s194_s28] ss:$0 sm:$0xff]  ;;  %v579_v55 = vld [vmem:[#allocation2 + $0xf8] sm:$0xff]  ;;  %v578_v56 = vld [vmem:[#allocation2 + $0xf0] sm:$0xff] }
  0x27   : > { %1102 = vmatprep.subr.mxu0 %v325_v13  ;;  %v577_v57 = vld [vmem:[#allocation2 + $0xe8] sm:$0xff]  ;;  %v576_v58 = vld [vmem:[#allocation2 + $0xe0] sm:$0xff]  ;;  %v575_v59 = vld [vmem:[#allocation2 + $0xd8] sm:$0xff] }
  0x28   : > { %1103 = vmatpush3.msra.mxu0 %v325_v13  ;;  %v574_v60 = vld [vmem:[#allocation2 + $0xd0] sm:$0xff]  ;;  %v573_v61 = vld [vmem:[#allocation2 + $0xc8] sm:$0xff]  ;;  %v572_v62 = vld [vmem:[#allocation2 + $0xc0] sm:$0xff] }
  0x29   : > { %234 = vperm.xlu1 %1314, %v205_v7   ;;  %231 = vperm.xlu0 %1313, %v204_v8   ;;  %v571_v63 = vld [vmem:[#allocation2 + $0xb8] sm:$0xff]  ;;  %v570_v0 = vld [vmem:[#allocation2 + $0xb0] sm:$0xff]  ;;  %v569_v1 = vld [vmem:[#allocation2 + $0xa8] sm:$0xff] }
  0x2a   : > { %1104 = vmatprep.subr.mxu0 %v324_v16  ;;  %v568_v2 = vld [vmem:[#allocation2 + $0xa0] sm:$0xff]  ;;  %v567_v3 = vld [vmem:[#allocation2 + $0x98] sm:$0xff]  ;;  %v566_v4 = vld [vmem:[#allocation2 + $0x90] sm:$0xff] }
  0x2b   : > { %1105 = vmatpush3.msra.mxu0 %v324_v16  ;;  %v565_v5 = vld [vmem:[#allocation2 + $0x88] sm:$0xff]  ;;  %v667_v33 = vld [vmem:[#allocation2 + $0x130] sm:$0xff] }
  0x2c   : > { %1106 = vmatprep.subr.mxu0 %v323_v19 }
  0x2d   : > { %240 = vperm.xlu1 %1314, %v207_v10   ;;  %237 = vperm.xlu0 %1313, %v206_v11  }
  0x2e   : > { %1107 = vmatpush3.msra.mxu0 %v323_v19 }
  0x2f   : > { %1108 = vmatprep.subr.mxu0 %v322_v20 }
  0x30   : > { %1109 = vmatpush3.msra.mxu0 %v322_v20 }
  0x31   : > { %246 = vperm.xlu1 %1314, %v209_v14   ;;  %243 = vperm.xlu0 %1313, %v208_v15  }
  0x32   : > { %1110 = vmatprep.subr.mxu0 %v321_v23 }
  0x33   : > { %1111 = vmatpush3.msra.mxu0 %v321_v23  ;;  %v677_v23 = vld [vmem:[#allocation2 + $0x180] sm:$0xff] }
  0x34   : > { %1112 = vmatprep.subr.mxu0 %v320_v26 }
  0x35   : > { %252 = vperm.xlu1 %1314, %v211_v17   ;;  %249 = vperm.xlu0 %1313, %v210_v18  }
  0x36   : > { %1113 = vmatpush3.msra.mxu0 %v320_v26  ;;  %v674_v26 = vld [vmem:[#allocation2 + $0x168] sm:$0xff] }
  0x37   : > { %1114 = vmatprep.subr.mxu0 %v319_v27 }
  0x38   : > { %1115 = vmatpush3.msra.mxu0 %v319_v27  ;;  %v673_v27 = vld [vmem:[#allocation2 + $0x160] sm:$0xff] }
  0x39   : > { %258 = vperm.xlu1 %1314, %v213_v21   ;;  %255 = vperm.xlu0 %1313, %v212_v22   ;;  %v564_v22 = vld [vmem:[#allocation2 + $0x80] sm:$0xff] }
  0x3a   : > { %1116 = vmatprep.subr.mxu0 %v318_v28 }
  0x3b   : > { %1117 = vmatpush3.msra.mxu0 %v318_v28  ;;  %v672_v28 = vld [vmem:[#allocation2 + $0x158] sm:$0xff] }
  0x3c   : > { %1118 = vmatprep.subr.mxu0 %v317_v29 }
  0x3d   : > { %264 = vperm.xlu1 %1314, %v215_v24   ;;  %261 = vperm.xlu0 %1313, %v214_v25   ;;  %v676_v24 = vld [vmem:[#allocation2 + $0x178] sm:$0xff]  ;;  %v675_v25 = vld [vmem:[#allocation2 + $0x170] sm:$0xff] }
  0x3e   : > { %1119 = vmatpush3.msra.mxu0 %v317_v29  ;;  %v671_v29 = vld [vmem:[#allocation2 + $0x150] sm:$0xff] }
  0x3f   : > { %1120 = vmatprep.subr.mxu0 %v316_v30 }
  0x40   : > { %1121 = vmatpush3.msra.mxu0 %v316_v30  ;;  %v670_v30 = vld [vmem:[#allocation2 + $0x148] sm:$0xff] }
  0x41   : > { %1122 = vmatprep.subr.mxu0 %v315_v31 }
  0x42   : > { %1123 = vmatpush3.msra.mxu0 %v315_v31  ;;  %v669_v31 = vld [vmem:[#allocation2 + $0x140] sm:$0xff] }
  0x43   : > { %1124 = vmatprep.subr.mxu0 %v314_v32 }
  0x44   : > { %1125 = vmatpush3.msra.mxu0 %v314_v32  ;;  %v668_v32 = vld [vmem:[#allocation2 + $0x138] sm:$0xff] }
  0x45   : > { %1185 = vmatprep.subr.mxu0 %v579_v55 }
  0x9c   : > { %v226_v35 = vpop.permute.xlu1 %225  ;;  %v220_v36 = vpop.permute.xlu0 %219 }
  0x9d   : > { %vm266_vm0 = vcmp.eq.s32.totalorder %v217_v34, %v220_v36  ;;  %vm268_vm1 = vcmp.eq.s32.totalorder %v217_v34, %v226_v35 }
  0x9e   : > { %1126 = vmatprep.mubr.msk.f32.mxu0 %vm266_vm0, %v1357_v37  ;;  %vm483_vm0 = vcmp.eq.s32.totalorder %v477_v52, %v1452_v53  ;;  %v764_v52 = vld [vmem:[#allocation2 + $0x1b0] sm:$0xff] }
  0x9f   : > { %1182 = vmatprep.mubr.msk.f32.mxu1 %vm483_vm0, %v1357_v37 }
  0xa0   : > { %v229_v38 = vpop.permute.xlu1 %228  ;;  %v223_v39 = vpop.permute.xlu0 %222 }
  0xa1   : > { %vm267_vm2 = vcmp.eq.s32.totalorder %v217_v34, %v223_v39  ;;  %vm269_vm3 = vcmp.eq.s32.totalorder %v217_v34, %v229_v38  ;;  %v664_v38 = vld [vmem:[#allocation2 + $0x118] sm:$0xff]  ;;  %v663_v39 = vld [vmem:[#allocation2 + $0x110] sm:$0xff] }
  0xa2   : > { %1127 = vmatmul.mubr.msk.f32.vlgmr.msra.gmra.mxu0 %vm267_vm2, %v1357_v37  ;;  %vm856_vm2 = vcmask 7168  }
  0xa3   : > { %1129 = vmatprep.mubr.msk.f32.mxu0 %vm268_vm1, %v1357_v37  ;;  %vm484_vm1 = vcmp.eq.s32.totalorder %v1454_v54, %v1452_v53  ;;  %1186 = vmatpush3.msra.mxu0 %v579_v55  ;;  %v983_v53 = vld [vmem:[#allocation2 + $0x100] ss:$0 sm:$0xff] }
  0xa4   : > { %v235_v40 = vpop.permute.xlu1 %234  ;;  %v232_v41 = vpop.permute.xlu0 %231  ;;  %1187 = vmatprep.subr.mxu0 %v578_v56 }
  0xa5   : > { %vm270_vm4 = vcmp.eq.s32.totalorder %v217_v34, %v232_v41  ;;  %vm271_vm5 = vcmp.eq.s32.totalorder %v217_v34, %v235_v40  ;;  %1188 = vmatpush3.msra.mxu0 %v578_v56  ;;  %v662_v40 = vld [vmem:[#allocation2 + $0x108] sm:$0xff] }
  0xa6   : > { %1130 = vmatmul.mubr.msk.f32.gmra.mxu0 %vm269_vm3, %v1357_v37  ;;  %1189 = vmatprep.subr.mxu0 %v577_v57  ;;  %v775_v41 = vld [vmem:[#allocation2 + $0x208] sm:$0xff] }
  0xa7   : > { %1132 = vmatprep.mubr.msk.f32.mxu0 %vm270_vm4, %v1357_v37  ;;  %1190 = vmatpush3.msra.mxu0 %v577_v57 }
  0xa8   : > { %v241_v42 = vpop.permute.xlu1 %240  ;;  %v238_v43 = vpop.permute.xlu0 %237  ;;  %1191 = vmatprep.subr.mxu0 %v576_v58 }
  0xa9   : > { %vm272_vm6 = vcmp.eq.s32.totalorder %v217_v34, %v238_v43  ;;  %vm273_vm7 = vcmp.eq.s32.totalorder %v217_v34, %v241_v42  ;;  %1192 = vmatpush3.msra.mxu0 %v576_v58  ;;  %v774_v42 = vld [vmem:[#allocation2 + $0x200] sm:$0xff]  ;;  %v773_v43 = vld [vmem:[#allocation2 + $0x1f8] sm:$0xff] }
  0xaa   : > { %1133 = vmatmul.mubr.msk.f32.gmra.mxu0 %vm271_vm5, %v1357_v37  ;;  %1193 = vmatprep.subr.mxu0 %v575_v59 }
  0xab   : > { %1135 = vmatprep.mubr.msk.f32.mxu0 %vm272_vm6, %v1357_v37  ;;  %1194 = vmatpush3.msra.mxu0 %v575_v59 }
  0xac   : > { %v247_v44 = vpop.permute.xlu1 %246  ;;  %v244_v45 = vpop.permute.xlu0 %243  ;;  %1195 = vmatprep.subr.mxu0 %v574_v60 }
  0xad   : > { %vm274_vm8 = vcmp.eq.s32.totalorder %v217_v34, %v244_v45  ;;  %vm275_vm9 = vcmp.eq.s32.totalorder %v217_v34, %v247_v44  ;;  %1196 = vmatpush3.msra.mxu0 %v574_v60  ;;  %v772_v44 = vld [vmem:[#allocation2 + $0x1f0] sm:$0xff]  ;;  %v771_v45 = vld [vmem:[#allocation2 + $0x1e8] sm:$0xff] }
  0xae   : > { %1136 = vmatmul.mubr.msk.f32.gmra.mxu0 %vm273_vm7, %v1357_v37  ;;  %1197 = vmatprep.subr.mxu0 %v573_v61  ;;  %v763_v60 = vld [vmem:[#allocation2 + $0x1a8] sm:$0xff] }
  0xaf   : > { %1138 = vmatprep.mubr.msk.f32.mxu0 %vm274_vm8, %v1357_v37  ;;  %1198 = vmatpush3.msra.mxu0 %v573_v61  ;;  %v762_v61 = vld [vmem:[#allocation2 + $0x1a0] sm:$0xff] }
  0xb0   : > { %v253_v46 = vpop.permute.xlu1 %252  ;;  %v250_v47 = vpop.permute.xlu0 %249  ;;  %1199 = vmatprep.subr.mxu0 %v572_v62 }
  0xb1   : > { %vm276_vm10 = vcmp.eq.s32.totalorder %v217_v34, %v250_v47  ;;  %vm277_vm11 = vcmp.eq.s32.totalorder %v217_v34, %v253_v46  ;;  %1200 = vmatpush3.msra.mxu0 %v572_v62  ;;  %v770_v46 = vld [vmem:[#allocation2 + $0x1e0] sm:$0xff]  ;;  %v769_v47 = vld [vmem:[#allocation2 + $0x1d8] sm:$0xff] }
  0xb2   : > { %1139 = vmatmul.mubr.msk.f32.gmra.mxu0 %vm275_vm9, %v1357_v37  ;;  %1201 = vmatprep.subr.mxu0 %v571_v63  ;;  %v761_v62 = vld [vmem:[#allocation2 + $0x198] sm:$0xff] }
  0xb3   : > { %1141 = vmatprep.mubr.msk.f32.mxu0 %vm276_vm10, %v1357_v37  ;;  %1202 = vmatpush3.msra.mxu0 %v571_v63  ;;  %v760_v63 = vld [vmem:[#allocation2 + $0x190] sm:$0xff] }
  0xb4   : > { %v259_v48 = vpop.permute.xlu1 %258  ;;  %v256_v49 = vpop.permute.xlu0 %255  ;;  %1203 = vmatprep.subr.mxu0 %v570_v0 }
  0xb5   : > { %vm278_vm12 = vcmp.eq.s32.totalorder %v217_v34, %v256_v49  ;;  %vm279_vm13 = vcmp.eq.s32.totalorder %v217_v34, %v259_v48  ;;  %1204 = vmatpush3.msra.mxu0 %v570_v0  ;;  %v768_v48 = vld [vmem:[#allocation2 + $0x1d0] sm:$0xff]  ;;  %v767_v49 = vld [vmem:[#allocation2 + $0x1c8] sm:$0xff] }
  0xb6   : > { %1142 = vmatmul.mubr.msk.f32.gmra.mxu0 %vm277_vm11, %v1357_v37  ;;  %1205 = vmatprep.subr.mxu0 %v569_v1  ;;  %v984_v0 = vld [vmem:[#allocation2 + $0x188] ss:$0 sm:$0xff] }
  0xb7   : > { %1144 = vmatprep.mubr.msk.f32.mxu0 %vm278_vm12, %v1357_v37  ;;  %1206 = vmatpush3.msra.mxu0 %v569_v1 }
  0xb8   : > { %v262_v50 = vpop.permute.xlu0 %261  ;;  %v265_v51 = vpop.permute.xlu1 %264  ;;  %1207 = vmatprep.subr.mxu0 %v568_v2 }
  0xb9   : > { %vm280_vm14 = vcmp.eq.s32.totalorder %v217_v34, %v262_v50  ;;  %vm281_vm15 = vcmp.eq.s32.totalorder %v217_v34, %v265_v51  ;;  %1208 = vmatpush3.msra.mxu0 %v568_v2  ;;  %v666_v34 = vld [vmem:[#allocation2 + $0x128] sm:$0xff]  ;;  %v766_v50 = vld [vmem:[#allocation2 + $0x1c0] sm:$0xff]  ;;  %v765_v51 = vld [vmem:[#allocation2 + $0x1b8] sm:$0xff] }
  0xba   : > { %1145 = vmatmul.mubr.msk.f32.gmra.mxu0 %vm279_vm13, %v1357_v37  ;;  %1209 = vmatprep.subr.mxu0 %v567_v3 }
  0xbb   : > { %1147 = vmatprep.mubr.msk.f32.mxu0 %vm280_vm14, %v1357_v37  ;;  %1210 = vmatpush3.msra.mxu0 %v567_v3 }
  0xbc   : > { %1211 = vmatprep.subr.mxu0 %v566_v4 }
  0xbd   : > { %1212 = vmatpush3.msra.mxu0 %v566_v4 }
  0xbe   : > { %1148 = vmatmul.mubr.msk.f32.gmra.mxu0 %vm281_vm15, %v1357_v37  ;;  %1213 = vmatprep.subr.mxu0 %v565_v5 }
  0xbf   : > { %1214 = vmatpush3.msra.mxu0 %v565_v5 }
  0xc0   : > { %1215 = vmatprep.subr.mxu0 %v564_v22 }
  0xc1   : > { %1216 = vmatpush3.msra.mxu0 %v564_v22 }
  0xc2   : > { %1255 = vmatprep.subr.mxu0 %v775_v41 }
 0x162   : > { %v1128_v6 = vpop.f32.mrf.mxu0 }
 0x164   : > { %v396_v7 = vpop.f32.mrf.mxu0 }
 0x166   : > { %v1131_v8 = vpop.f32.mrf.mxu0 }
 0x168   : > { %v406_v9 = vpop.f32.mrf.mxu0 }
 0x16a   : > { %v1134_v10 = vpop.f32.mrf.mxu0 }
 0x16c   : > { %v416_v11 = vpop.f32.mrf.mxu0 }
 0x16e   : > { %v1137_v12 = vpop.f32.mrf.mxu0 }
 0x170   : > { %v426_v13 = vpop.f32.mrf.mxu0 }
 0x172   : > { %v1140_v14 = vpop.f32.mrf.mxu0 }
 0x174   : > { %v436_v15 = vpop.f32.mrf.mxu0 }
 0x176   : > { %v1143_v16 = vpop.f32.mrf.mxu0 }
 0x178   : > { %v446_v17 = vpop.f32.mrf.mxu0 }
 0x17a   : > { %v1146_v18 = vpop.f32.mrf.mxu0 }
 0x17c   : > { %v456_v19 = vpop.f32.mrf.mxu0 }
 0x17e   : > { %v1149_v20 = vpop.f32.mrf.mxu0 }
 0x17f   : > { %1150 = vmatprep.subr.mxu1 %v1149_v20 }
 0x180   : > { %v466_v21 = vpop.f32.mrf.mxu0  ;;  %1151 = vmatpush3.msra.mxu1 %v1149_v20 }
 0x181   : > { %1152 = vmatprep.subr.mxu1 %v466_v21 }
 0x182   : > { %1153 = vmatpush3.msra.mxu1 %v466_v21 }
 0x183   : > { %1154 = vmatprep.subr.mxu1 %v1146_v18 }
 0x184   : > { %1155 = vmatpush3.msra.mxu1 %v1146_v18 }
 0x185   : > { %1156 = vmatprep.subr.mxu1 %v456_v19 }
 0x186   : > { %1157 = vmatpush3.msra.mxu1 %v456_v19 }
 0x187   : > { %1158 = vmatprep.subr.mxu1 %v1143_v16 }
 0x188   : > { %1159 = vmatpush3.msra.mxu1 %v1143_v16 }
 0x189   : > { %1160 = vmatprep.subr.mxu1 %v446_v17 }
 0x18a   : > { %1161 = vmatpush3.msra.mxu1 %v446_v17 }
 0x18b   : > { %1162 = vmatprep.subr.mxu1 %v1140_v14 }
 0x18c   : > { %1163 = vmatpush3.msra.mxu1 %v1140_v14 }
 0x18d   : > { %1164 = vmatprep.subr.mxu1 %v436_v15 }
 0x18e   : > { %1165 = vmatpush3.msra.mxu1 %v436_v15 }
 0x18f   : > { %1166 = vmatprep.subr.mxu1 %v1137_v12 }
 0x190   : > { %1167 = vmatpush3.msra.mxu1 %v1137_v12 }
 0x191   : > { %1168 = vmatprep.subr.mxu1 %v426_v13 }
 0x192   : > { %1169 = vmatpush3.msra.mxu1 %v426_v13 }
 0x193   : > { %1170 = vmatprep.subr.mxu1 %v1134_v10 }
 0x194   : > { %1171 = vmatpush3.msra.mxu1 %v1134_v10 }
 0x195   : > { %1172 = vmatprep.subr.mxu1 %v416_v11 }
 0x196   : > { %1173 = vmatpush3.msra.mxu1 %v416_v11 }
 0x197   : > { %1174 = vmatprep.subr.mxu1 %v1131_v8 }
 0x198   : > { %1175 = vmatpush3.msra.mxu1 %v1131_v8 }
 0x199   : > { %1176 = vmatprep.subr.mxu1 %v406_v9 }
 0x19a   : > { %1177 = vmatpush3.msra.mxu1 %v406_v9 }
 0x19b   : > { %1178 = vmatprep.subr.mxu1 %v1128_v6 }
 0x19c   : > { %1179 = vmatpush3.msra.mxu1 %v1128_v6 }
 0x19d   : > { %1180 = vmatprep.subr.mxu1 %v396_v7 }
 0x19e   : > { %1181 = vmatpush3.msra.mxu1 %v396_v7  ;;  %v985_v7 = vld [vmem:[#allocation2 + $0x210] ss:$0 sm:$0xff] }
 0x19f   : > { %1183 = vmatmul.mubr.msk.f32.vlgmr.msra.gmra.mxu1 %vm484_vm1, %v1357_v37  ;;  %1220 = vmatprep.subr.mxu1 %v677_v23  ;;  %v665_v37 = vld [vmem:[#allocation2 + $0x120] sm:$0xff] }
 0x1a0   : > { %1221 = vmatpush3.msra.mxu1 %v677_v23 }
 0x1a1   : > { %1222 = vmatprep.subr.mxu1 %v676_v24 }
 0x1a2   : > { %1223 = vmatpush3.msra.mxu1 %v676_v24 }
 0x1a3   : > { %1224 = vmatprep.subr.mxu1 %v675_v25 }
 0x1a4   : > { %1225 = vmatpush3.msra.mxu1 %v675_v25 }
 0x1a5   : > { %1226 = vmatprep.subr.mxu1 %v674_v26 }
 0x1a6   : > { %1227 = vmatpush3.msra.mxu1 %v674_v26 }
 0x1a7   : > { %1228 = vmatprep.subr.mxu1 %v673_v27 }
 0x1a8   : > { %1229 = vmatpush3.msra.mxu1 %v673_v27 }
 0x1a9   : > { %1230 = vmatprep.subr.mxu1 %v672_v28 }
 0x1aa   : > { %1231 = vmatpush3.msra.mxu1 %v672_v28 }
 0x1ab   : > { %1232 = vmatprep.subr.mxu1 %v671_v29 }
 0x1ac   : > { %1233 = vmatpush3.msra.mxu1 %v671_v29 }
 0x1ad   : > { %1234 = vmatprep.subr.mxu1 %v670_v30 }
 0x1ae   : > { %1235 = vmatpush3.msra.mxu1 %v670_v30 }
 0x1af   : > { %1236 = vmatprep.subr.mxu1 %v669_v31 }
 0x1b0   : > { %1237 = vmatpush3.msra.mxu1 %v669_v31 }
 0x1b1   : > { %1238 = vmatprep.subr.mxu1 %v668_v32 }
 0x1b2   : > { %1239 = vmatpush3.msra.mxu1 %v668_v32 }
 0x1b3   : > { %1240 = vmatprep.subr.mxu1 %v667_v33 }
 0x1b4   : > { %1241 = vmatpush3.msra.mxu1 %v667_v33 }
 0x1b5   : > { %1242 = vmatprep.subr.mxu1 %v666_v34 }
 0x1b6   : > { %1243 = vmatpush3.msra.mxu1 %v666_v34 }
 0x1b7   : > { %1244 = vmatprep.subr.mxu1 %v665_v37 }
 0x1b8   : > { %1245 = vmatpush3.msra.mxu1 %v665_v37 }
 0x1b9   : > { %1246 = vmatprep.subr.mxu1 %v664_v38 }
 0x1ba   : > { %1247 = vmatpush3.msra.mxu1 %v664_v38 }
 0x1bb   : > { %1248 = vmatprep.subr.mxu1 %v663_v39 }
 0x1bc   : > { %1249 = vmatpush3.msra.mxu1 %v663_v39 }
 0x1bd   : > { %1250 = vmatprep.subr.mxu1 %v662_v40 }
 0x1be   : > { %1251 = vmatpush3.msra.mxu1 %v662_v40 }
 0x25f   : > { %v1184_v35 = vpop.f32.mrf.mxu1 }
 0x261   : > { %v555_v36 = vpop.f32.mrf.mxu1 }
 0x262   : > { %1217 = vmatprep.mubr.f32.mxu0 %v555_v36 }
 0x263   : > { %1218 = vmatmul.mubr.f32.vlgmr.msra.gmra.mxu0 %v1184_v35 }
 0x264   : > { %1256 = vmatpush3.msra.mxu0 %v775_v41 }
 0x265   : > { %1257 = vmatprep.subr.mxu0 %v774_v42 }
 0x266   : > { %1258 = vmatpush3.msra.mxu0 %v774_v42 }
 0x267   : > { %1259 = vmatprep.subr.mxu0 %v773_v43 }
 0x268   : > { %1260 = vmatpush3.msra.mxu0 %v773_v43 }
 0x269   : > { %1261 = vmatprep.subr.mxu0 %v772_v44 }
 0x26a   : > { %1262 = vmatpush3.msra.mxu0 %v772_v44 }
 0x26b   : > { %1263 = vmatprep.subr.mxu0 %v771_v45 }
 0x26c   : > { %1264 = vmatpush3.msra.mxu0 %v771_v45 }
 0x26d   : > { %1265 = vmatprep.subr.mxu0 %v770_v46 }
 0x26e   : > { %1266 = vmatpush3.msra.mxu0 %v770_v46 }
 0x26f   : > { %1267 = vmatprep.subr.mxu0 %v769_v47 }
 0x270   : > { %1268 = vmatpush3.msra.mxu0 %v769_v47 }
 0x271   : > { %1269 = vmatprep.subr.mxu0 %v768_v48 }
 0x272   : > { %1270 = vmatpush3.msra.mxu0 %v768_v48 }
 0x273   : > { %1271 = vmatprep.subr.mxu0 %v767_v49 }
 0x274   : > { %1272 = vmatpush3.msra.mxu0 %v767_v49 }
 0x275   : > { %1273 = vmatprep.subr.mxu0 %v766_v50 }
 0x276   : > { %1274 = vmatpush3.msra.mxu0 %v766_v50 }
 0x277   : > { %1275 = vmatprep.subr.mxu0 %v765_v51 }
 0x278   : > { %1276 = vmatpush3.msra.mxu0 %v765_v51 }
 0x279   : > { %1277 = vmatprep.subr.mxu0 %v764_v52 }
 0x27a   : > { %1278 = vmatpush3.msra.mxu0 %v764_v52 }
 0x27b   : > { %1279 = vmatprep.subr.mxu0 %v763_v60 }
 0x27c   : > { %1280 = vmatpush3.msra.mxu0 %v763_v60 }
 0x27d   : > { %1281 = vmatprep.subr.mxu0 %v762_v61 }
 0x27e   : > { %1282 = vmatpush3.msra.mxu0 %v762_v61 }
 0x27f   : > { %1283 = vmatprep.subr.mxu0 %v761_v62 }
 0x280   : > { %1284 = vmatpush3.msra.mxu0 %v761_v62 }
 0x281   : > { %1285 = vmatprep.subr.mxu0 %v760_v63 }
 0x282   : > { %1286 = vmatpush3.msra.mxu0 %v760_v63 }
 0x323   : > { %v1219_v54 = vpop.f32.mrf.mxu0 }
 0x324   : > { %v657_v55 = vadd.f32 %v1219_v54, %v983_v53 }
 0x325   : > { %v651_v56 = vpop.f32.mrf.mxu0 }
 0x326   : > { %v652_v57 = vadd.f32 %v983_v53, %v651_v56  ;;  %v661_v59 = vmax.f32 %v657_v55, 0.0 }
 0x328   : > { %v660_v58 = vmax.f32 %v652_v57, 0.0 }
 0x32a   : > { %1252 = vmatprep.mubr.f32.mxu1 %v660_v58 }
 0x32b   : > { %1253 = vmatmul.mubr.f32.vlgmr.msra.gmra.mxu1 %v661_v59 }
 0x3eb   : > { %v1254_v1 = vpop.f32.mrf.mxu1 }
 0x3ec   : > { %v755_v2 = vadd.f32 %v1254_v1, %v984_v0 }
 0x3ed   : > { %v749_v3 = vpop.f32.mrf.mxu1 }
 0x3ee   : > { %v750_v4 = vadd.f32 %v984_v0, %v749_v3  ;;  %v759_v6 = vmax.f32 %v755_v2, 0.0 }
 0x3f0   : > { %v758_v5 = vmax.f32 %v750_v4, 0.0 }
 0x3f2   : > { %1287 = vmatprep.mubr.f32.mxu0 %v758_v5 }
 0x3f3   : > { %1288 = vmatmul.mubr.f32.vlgmr.msra.gmra.mxu0 %v759_v6 }
 0x4b3   : > { %v1289_v8 = vpop.f32.mrf.mxu0 }
 0x4b4   : > { %v853_v9 = vadd.f32 %v1289_v8, %v985_v7 }
 0x4b5   : > { %v847_v10 = vpop.f32.mrf.mxu0 }
 0x4b6   : > { %858 = vst.msk [vmem:[%s199_s5 + $0x8] sm:$0xff] %vm856_vm2, %v853_v9  ;;  %v848_v11 = vadd.f32 %v985_v7, %v847_v10 }
 0x4b8   : > { %857 = vst.msk [vmem:[%s199_s5] sm:$0xff] %vm856_vm2, %v848_v11 }
 0x4b9 PF: > { %s14_s12 = sadd.s32 1, %s1351_s12  }
 0x4ba   : > { %p11_p1 = scmp.ge.s32.totalorder %s14_s12, 4  }
 0x4bc   :  { %13 = sbr.rel (!%p11_p1) target bundleno = 1 (0x1), region = 70 }
 0x4c1   :  { %880 = vsyncpa [#allocation3], 1 }
 0x4c2   :  { %882 = vsyncpa [#allocation3 + $0x1], 1 }

</bundles_post_ra>
